<compile_context>
chip_gen: v6e
topology: v6e:2x2x1
jax: 0.10.0
libtpu: 0.0.40
codegen_flags: <defaults>
</compile_context>

<pallas_src>
import functools
import math

import jax
import jax.numpy as jnp
from jax import lax
from jax.experimental import pallas as pl
from jax.experimental.pallas import tpu as pltpu


def _gelu(x, approx=False):
    if approx:
        # tanh approximation: routed to the EUP slot (nearly free once MXU-bound)
        c = math.sqrt(2.0 / math.pi)
        return 0.5 * x * (1.0 + jnp.tanh(c * (x + 0.044715 * x * x * x)))
    # exact GELU (PyTorch nn.GELU() default)
    return 0.5 * x * (1.0 + lax.erf(x * (1.0 / math.sqrt(2.0))))


def _min_sublane(dtype):
    return {4: 8, 2: 16, 1: 32}.get(jnp.dtype(dtype).itemsize, 8)


def _pick_tile(dim, target, aligns):
    """Largest divisor of `dim` <= target that is a multiple of one of `aligns`
    (tried in order), falling back to the full dimension (always legal)."""
    if dim <= target:
        return dim
    for align in aligns:
        t = (min(target, dim) // align) * align
        while t >= align:
            if dim % t == 0:
                return t
            t -= align
    return dim


def _vmem_limit_bytes(estimate):
    # Scoped default is only 16 MiB (v5e) / 32 MiB (v6e, v7x); raise it explicitly.
    # Capped at 64 MiB so the same value is safe on v7x's 64 MiB-per-TC VMEM.
    return int(min(max(1.5 * estimate + (4 << 20), 32 << 20), 64 << 20))


# ----------------------------- linear mode -----------------------------------

def _ffn_linear_kernel(x_ref, w1_ref, w2_ref, o_ref, *, th, gelu_approx,
                       compute_dtype):
    x_res = x_ref[0]                              # (tS, D) original precision (residual)
    x = x_res.astype(compute_dtype)               # matmul operand
    tS, D = x.shape
    H = w1_ref.shape[1]
    n_chunks = H // th

    def one_chunk(off):
        w1c = w1_ref[:, pl.ds(off, th)]           # (D, th)  -- VMEM-resident weight slice
        h = jnp.dot(x, w1c, preferred_element_type=jnp.float32)      # (tS, th) f32
        h = _gelu(h, approx=gelu_approx).astype(compute_dtype)
        w2c = w2_ref[pl.ds(off, th), :]           # (th, D)
        return jnp.dot(h, w2c, preferred_element_type=jnp.float32)   # (tS, D) f32

    if n_chunks == 1:
        acc = one_chunk(0)
    else:
        def body(k, acc):
            off = pl.multiple_of(k * th, th)      # th is 128/256-aligned
            return acc + one_chunk(off)
        acc = lax.fori_loop(0, n_chunks, body,
                            jnp.zeros((tS, D), jnp.float32),
                            unroll=(n_chunks <= 8))

    o_ref[0] = (x_res.astype(jnp.float32) + acc).astype(o_ref.dtype)


def ffn_linear(x, w1, w2, *, compute_dtype=jnp.bfloat16,
               ts_target=512, th_target=512, gelu_approx=False):
    """x: [B,S,D], w1: [D,H], w2: [H,D] (transposed nn.Linear weights).
    Returns x + gelu(x @ w1) @ w2, residual added in x's original precision."""
    B, S, D = x.shape
    H = w1.shape[1]

    tS = _pick_tile(S, ts_target, (128, _min_sublane(x.dtype)))
    tH = _pick_tile(H, th_target, (256, 128))

    w1c = w1.astype(compute_dtype)
    w2c = w2.astype(compute_dtype)

    wbytes = (w1c.size + w2c.size) * jnp.dtype(compute_dtype).itemsize
    xblk = tS * D * x.dtype.itemsize
    est = 2 * wbytes + 4 * xblk + 2 * tS * tH * 4
    cost = pl.CostEstimate(flops=4 * B * S * D * H,
                           transcendentals=B * S * H,
                           bytes_accessed=2 * x.size * x.dtype.itemsize + wbytes)

    kernel = functools.partial(_ffn_linear_kernel, th=tH,
                               gelu_approx=gelu_approx,
                               compute_dtype=compute_dtype)
    return pl.pallas_call(
        kernel,
        out_shape=jax.ShapeDtypeStruct((B, S, D), x.dtype),
        grid_spec=pltpu.PrefetchScalarGridSpec(
            num_scalar_prefetch=0,
            grid=(B, S // tS),
            in_specs=[
                pl.BlockSpec((1, tS, D), lambda b, s: (b, s, 0)),
                pl.BlockSpec((D, H), lambda b, s: (0, 0)),    # resident (constant index)
                pl.BlockSpec((H, D), lambda b, s: (0, 0)),    # resident (constant index)
            ],
            out_specs=pl.BlockSpec((1, tS, D), lambda b, s: (b, s, 0)),
        ),
        compiler_params=pltpu.CompilerParams(
            dimension_semantics=("parallel", "parallel"),
            vmem_limit_bytes=_vmem_limit_bytes(est)),
        cost_estimate=cost,
    )(x, w1c, w2c)


# ------------------------------ conv mode -------------------------------------

def _ffn_conv_kernel(xpad_ref, w1_ref, w2_ref, o_ref, *, tS, gelu_approx,
                     compute_dtype):
    # xpad_ref: (1, S+4, D) full padded sequence (2 zero rows each side), original dtype.
    # w1_ref:   (3, D, H) tap weights; w2_ref: (3, H, D) tap weights (compute dtype).
    s = pl.program_id(1)
    S = xpad_ref.shape[1] - 4
    D = xpad_ref.shape[2]
    H = w1_ref.shape[2]
    start = pl.multiple_of(s * tS, tS)

    xv = xpad_ref.at[0]                              # (S+4, D) view, no load

    # conv1 + GELU on a (tS+2)-row hidden window (1-row halo each side, recomputed
    # per tile), tap-wise accumulation in f32 (no im2col concat / relayout).
    hwin = jnp.zeros((tS + 2, H), jnp.float32)
    for k in range(3):                               # static tap loop
        xk = xv[pl.ds(start + k, tS + 2), :].astype(compute_dtype)   # (tS+2, D)
        hwin = hwin + jnp.dot(xk, w1_ref[k], preferred_element_type=jnp.float32)
    hwin = _gelu(hwin, approx=gelu_approx)

    # Hidden positions outside [0, S) are literal zero padding for conv2 (PyTorch).
    gidx = (start - 1) + lax.broadcasted_iota(jnp.int32, (tS + 2, 1), 0)
    hwin = jnp.where((gidx >= 0) & (gidx < S), hwin, 0.0).astype(compute_dtype)

    # conv2: tap-wise accumulation on shifted static slices of the hidden window.
    y = jnp.zeros((tS, D), jnp.float32)
    for k in range(3):
        y = y + jnp.dot(hwin[k:k + tS], w2_ref[k], preferred_element_type=jnp.float32)

    x_res = xv[pl.ds(start + 2, tS), :]              # original rows [start, start+tS)
    o_ref[0] = (x_res.astype(jnp.float32) + y).astype(o_ref.dtype)


def ffn_conv(x, cw1, cw2, *, compute_dtype=jnp.bfloat16,
             ts_target=256, gelu_approx=False):
    """x: [B,S,D]; cw1: [H,D,3], cw2: [D,H,3] in PyTorch Conv1d weight layout.
    Returns x + conv2(gelu(conv1(x))) with k=3, pad=1, no bias."""
    B, S, D = x.shape
    H = cw1.shape[0]
    tS = _pick_tile(S, ts_target, (128, _min_sublane(x.dtype)))

    xpad = jnp.pad(x, ((0, 0), (2, 2), (0, 0)))      # 2 zero rows each side of S
    # [out, in, k] -> [k, in, out]
    w1t = jnp.transpose(cw1, (2, 1, 0)).astype(compute_dtype)   # (3, D, H)
    w2t = jnp.transpose(cw2, (2, 1, 0)).astype(compute_dtype)   # (3, H, D)

    wbytes = (w1t.size + w2t.size) * jnp.dtype(compute_dtype).itemsize
    est = (2 * wbytes + 2 * (S + 4) * D * x.dtype.itemsize
           + 2 * tS * D * x.dtype.itemsize + (tS + 2) * H * 4)
    cost = pl.CostEstimate(flops=12 * B * S * D * H,
                           transcendentals=B * S * H,
                           bytes_accessed=2 * x.size * x.dtype.itemsize + wbytes)

    kernel = functools.partial(_ffn_conv_kernel, tS=tS,
                               gelu_approx=gelu_approx,
                               compute_dtype=compute_dtype)
    return pl.pallas_call(
        kernel,
        out_shape=jax.ShapeDtypeStruct((B, S, D), x.dtype),
        grid_spec=pltpu.PrefetchScalarGridSpec(
            num_scalar_prefetch=0,
            grid=(B, S // tS),
            in_specs=[
                pl.BlockSpec((1, S + 4, D), lambda b, s: (b, 0, 0)),  # revisit-resident per b
                pl.BlockSpec((3, D, H), lambda b, s: (0, 0, 0)),       # resident tap weights
                pl.BlockSpec((3, H, D), lambda b, s: (0, 0, 0)),
            ],
            out_specs=pl.BlockSpec((1, tS, D), lambda b, s: (b, s, 0)),
        ),
        compiler_params=pltpu.CompilerParams(
            dimension_semantics=("parallel", "parallel"),
            vmem_limit_bytes=_vmem_limit_bytes(est)),
        cost_estimate=cost,
    )(xpad, w1t, w2t)


# --------------------------- pure-JAX references -------------------------------

def _rt(a, dt):
    """Round-trip through the compute dtype (mirrors the kernel's operand casts)."""
    return a.astype(dt).astype(jnp.float32)


def _ref_linear(x, w1, w2, compute_dtype):
    xc, w1c, w2c = _rt(x, compute_dtype), _rt(w1, compute_dtype), _rt(w2, compute_dtype)
    h = _rt(_gelu(xc @ w1c), compute_dtype)
    return x + h @ w2c                               # residual in original precision


def _conv1d_ref(x_bsd, w_oik):
    """Conv1d(kernel=3, padding=1, bias=False) on [B,S,Cin], weight [Cout,Cin,3]."""
    B, S, _ = x_bsd.shape
    xp = jnp.pad(x_bsd, ((0, 0), (1, 1), (0, 0)))
    out = 0.0
    for k in range(3):
        out = out + jnp.einsum("bsi,oi->bso", xp[:, k:k + S, :], w_oik[:, :, k])
    return out


def _ref_conv(x, cw1, cw2, compute_dtype):
    xc, w1c, w2c = _rt(x, compute_dtype), _rt(cw1, compute_dtype), _rt(cw2, compute_dtype)
    h = _rt(_gelu(_conv1d_ref(xc, w1c)), compute_dtype)
    return x + _conv1d_ref(h, w2c)


# ----------------------------------- main --------------------------------------

if __name__ == "__main__":
    key = jax.random.PRNGKey(0)
    k_small, k_big = jax.random.split(key)

    cases = [
        # (key, B, S, D, H, linear kwargs, conv kwargs, rtol, atol)
        (k_small, 2, 8, 16, 32, {}, {}, 5e-3, 5e-3),
        # exercises S tiling, the chunked-H inner loop and the conv halo recompute
        (k_big, 2, 512, 128, 1024,
         dict(ts_target=256, th_target=512), dict(ts_target=128), 1e-2, 2e-2),
    ]

    for (k, B, S, D, H, lin_kw, conv_kw, rtol, atol) in cases:
        kx, k1, k2, k3, k4 = jax.random.split(k, 5)
        x = jax.random.normal(kx, (B, S, D), jnp.float32)

        # linear-mode params (pre-transposed relative to nn.Linear.weight)
        w1 = jax.random.normal(k1, (D, H), jnp.float32) / math.sqrt(D)
        w2 = jax.random.normal(k2, (H, D), jnp.float32) / math.sqrt(H)

        # conv-mode params in PyTorch Conv1d layout [out, in, kernel=3]
        cw1 = jax.random.normal(k3, (H, D, 3), jnp.float32) / math.sqrt(3 * D)
        cw2 = jax.random.normal(k4, (D, H, 3), jnp.float32) / math.sqrt(3 * H)

        out_lin = jax.block_until_ready(ffn_linear(x, w1, w2, **lin_kw))
        out_conv = jax.block_until_ready(ffn_conv(x, cw1, cw2, **conv_kw))

        ref_lin = _ref_linear(x, w1, w2, jnp.bfloat16)
        ref_conv = _ref_conv(x, cw1, cw2, jnp.bfloat16)

        assert out_lin.shape == (B, S, D) and out_conv.shape == (B, S, D)
        assert jnp.allclose(out_lin, ref_lin, rtol=rtol, atol=atol), \
            float(jnp.abs(out_lin - ref_lin).max())
        assert jnp.allclose(out_conv, ref_conv, rtol=rtol, atol=atol), \
            float(jnp.abs(out_conv - ref_conv).max())

    print("KERNEL_OK")
</pallas_src>

<mosaic_0001>
module attributes {stable_mosaic.version = 11 : i64} {
  func.func @_ffn_linear_kernel(%arg0: i32, %arg1: i32, %arg2: memref<1x8x16xf32, #tpu.memory_space<vmem>>, %arg3: memref<16x32xbf16, #tpu.memory_space<vmem>>, %arg4: memref<32x16xbf16, #tpu.memory_space<vmem>>, %arg5: memref<1x8x16xf32, #tpu.memory_space<vmem>>) attributes {dimension_semantics = [#tpu.dimension_semantics<parallel>, #tpu.dimension_semantics<parallel>], iteration_bounds = array<i64: 2, 1>, scalar_prefetch = 0 : i64, scratch_operands = 0 : i64, tpu.core_type = #tpu.core_type<tc>, window_params = [{transform_indices = @transform_0, window_bounds = array<i64: 1, 8, 16>}, {pipeline_mode = #tpu.pipeline_mode<synchronous>, transform_indices = @transform_1, window_bounds = array<i64: 16, 32>}, {pipeline_mode = #tpu.pipeline_mode<synchronous>, transform_indices = @transform_2, window_bounds = array<i64: 32, 16>}, {transform_indices = @transform_3, window_bounds = array<i64: 1, 8, 16>}]} {
    %c0 = arith.constant 0 : index
    %c0_0 = arith.constant 0 : index
    %c0_1 = arith.constant 0 : index
    %0 = vector.load %arg2[%c0, %c0_0, %c0_1] : memref<1x8x16xf32, #tpu.memory_space<vmem>>, vector<1x8x16xf32>
    %1 = vector.shape_cast %0 : vector<1x8x16xf32> to vector<8x16xf32>
    %2 = arith.truncf %1 : vector<8x16xf32> to vector<8x16xbf16>
    %c0_2 = arith.constant 0 : index
    %c0_3 = arith.constant 0 : index
    %3 = vector.load %arg3[%c0_2, %c0_3] : memref<16x32xbf16, #tpu.memory_space<vmem>>, vector<16x32xbf16>
    %cst = arith.constant dense<0.000000e+00> : vector<8x32xf32>
    %4 = tpu.matmul %2, %3, %cst {dimension_numbers = #tpu.dot_dimension_numbers<[1], [0], [0], [1], [0, 0, 1, 1], [], []>} : vector<8x16xbf16>, vector<16x32xbf16>, vector<8x32xf32> -> vector<8x32xf32>
    %cst_4 = arith.constant 5.000000e-01 : f32
    %5 = vector.broadcast %cst_4 : f32 to vector<8x32xf32>
    %6 = arith.mulf %5, %4 : vector<8x32xf32>
    %cst_5 = arith.constant 0.707106769 : f32
    %7 = vector.broadcast %cst_5 : f32 to vector<8x32xf32>
    %8 = arith.mulf %4, %7 : vector<8x32xf32>
    %9 = math.erf %8 : vector<8x32xf32>
    %cst_6 = arith.constant 1.000000e+00 : f32
    %10 = vector.broadcast %cst_6 : f32 to vector<8x32xf32>
    %11 = arith.addf %10, %9 : vector<8x32xf32>
    %12 = arith.mulf %6, %11 : vector<8x32xf32>
    %13 = arith.truncf %12 : vector<8x32xf32> to vector<8x32xbf16>
    %c0_7 = arith.constant 0 : index
    %c0_8 = arith.constant 0 : index
    %14 = vector.load %arg4[%c0_7, %c0_8] : memref<32x16xbf16, #tpu.memory_space<vmem>>, vector<32x16xbf16>
    %cst_9 = arith.constant dense<0.000000e+00> : vector<8x16xf32>
    %15 = tpu.matmul %13, %14, %cst_9 {dimension_numbers = #tpu.dot_dimension_numbers<[1], [0], [0], [1], [0, 0, 1, 1], [], []>} : vector<8x32xbf16>, vector<32x16xbf16>, vector<8x16xf32> -> vector<8x16xf32>
    %16 = arith.addf %1, %15 : vector<8x16xf32>
    %c0_10 = arith.constant 0 : index
    %c0_11 = arith.constant 0 : index
    %c0_12 = arith.constant 0 : index
    %17 = vector.load %arg5[%c0_10, %c0_11, %c0_12] : memref<1x8x16xf32, #tpu.memory_space<vmem>>, vector<1x8x16xf32>
    %18 = vector.shape_cast %17 : vector<1x8x16xf32> to vector<8x16xf32>
    %19 = vector.shape_cast %16 : vector<8x16xf32> to vector<1x8x16xf32>
    tpu.vector_store %arg5[%c0_10, %c0_11, %c0_12], %19 {strides = array<i32>} : memref<1x8x16xf32, #tpu.memory_space<vmem>>, vector<1x8x16xf32>,
    return
  }
  func.func @transform_0(%arg0: i32, %arg1: i32) -> (i32, i32, i32) {
    %c0_i32 = arith.constant 0 : i32
    %c0_i32_0 = arith.constant 0 : i32
    return %arg0, %arg1, %c0_i32 : i32, i32, i32
  }
  func.func @transform_1(%arg0: i32, %arg1: i32) -> (i32, i32) {
    %c0_i32 = arith.constant 0 : i32
    %c0_i32_0 = arith.constant 0 : i32
    %c0_i32_1 = arith.constant 0 : i32
    return %c0_i32, %c0_i32_0 : i32, i32
  }
  func.func @transform_2(%arg0: i32, %arg1: i32) -> (i32, i32) {
    %c0_i32 = arith.constant 0 : i32
    %c0_i32_0 = arith.constant 0 : i32
    %c0_i32_1 = arith.constant 0 : i32
    return %c0_i32, %c0_i32_0 : i32, i32
  }
  func.func @transform_3(%arg0: i32, %arg1: i32) -> (i32, i32, i32) {
    %c0_i32 = arith.constant 0 : i32
    %c0_i32_0 = arith.constant 0 : i32
    return %arg0, %arg1, %c0_i32 : i32, i32, i32
  }
}

</mosaic_0001>

<bundles_post_ra>
// kernel: tpu_custom_call.1
= control target key start
LH: loop header
LB: loop body
LE: loop exit
PB: predicated region body
PF: predicated region fallthrough
CT: control target
= control target key end

     0   :  { %8 = vsyncpa [#allocation3], 0  ;;  %s720_s0 = inlined_call_operand.vmem [shape: f32[2,8,16], index: 0, kind: input, shape index: {}]   ;;  %s721_s1 = inlined_call_operand.vmem [shape: bf16[16,32], index: 1, kind: input, shape index: {}]   ;;  %s722_s2 = inlined_call_operand.vmem [shape: bf16[32,16], index: 2, kind: input, shape index: {}]   ;;  %s723_s3 = inlined_call_operand.hbm [shape: f32[2,8,16], index: 3, kind: output, shape index: {}]  }
   0x1   :  { %10 = vsyncpa [#allocation3 + $0x1], 0  ;;  %s598_s12 = smov 0   ;;  %s600_s13 = smov 0  }
   0x2   :  { %s602_s14 = smov 0   ;;  %s604_s15 = smov 0  }
   0x3   :  { %s606_s16 = smov 0   ;;  %s608_s17 = smov 0  }
   0x4 LB: > { %s400_s18 = sadd.s32 4294967295, %s573_s17   ;;  %s401_s19 = sadd.s32 4294967294, %s573_s17   ;;  %s573_s17 = sphi %s608_s17, %s16_s17   ;;  %s569_s16 = sphi %s606_s16, %s730_s16   ;;  %s565_s15 = sphi %s604_s15, %s729_s15   ;;  %s561_s14 = sphi %s602_s14, %s728_s14   ;;  %s557_s13 = sphi %s600_s13, %s727_s13   ;;  %s553_s12 = sphi %s598_s12, %s726_s12  }
   0x5   : > { %s28_s20 = sadd.s32 1, %s569_s16  ;;  %s107_s21 = sadd.s32 1, %s561_s14 }
   0x6   : > { %p30_p0 = scmp.ge.s32.totalorder %s28_s20, 2  ;;  %p117_p1 = scmp.ne.s32.totalorder %s561_s14, %s557_s13 }
   0x7   : > { %p118_p2 = scmp.eq.s32.totalorder %s400_s18, 1  ;;  %p123_p3 = scmp.ne.s32.totalorder %s557_s13, %s553_s12 }
   0x8   : > { %s732_s20 = smov (%p30_p0, %s28_s20), 0  ;;  %p124_p5 = scmp.eq.s32.totalorder %s401_s19, 1 }
   0x9   : > { %p638_p4 = por %p118_p2, %p117_p1  ;;  %s102_s23 = ssub.s32 %s569_s16, %s732_s20 }
   0xa   : > { %p404_p6 = scmp.ge.s32.totalorder %s573_s17, 1  ;;  %p105_p7 = scmp.eq.s32.totalorder %s102_s23, 0 }
   0xb   : > { %p645_p8 = por %p124_p5, %p123_p3  ;;  %p158_p9 = scmp.lt.s32.totalorder %s573_s17, 3 }
   0xc   : > { %s651_s25 = scalar_select %p105_p7, %s561_s14, %s107_s21  }
   0xd   : > { %p159_p10 = pnand %p404_p6, %p158_p9 }
   0xe   : > { %p184_p11 = scmp.lt.s32.totalorder (!%p159_p10), %s565_s15, 1  ;;  %s181_s10 = sand.u32 (!%p159_p10), 1, %s557_s13  }
   0xf   : > { %162 = sbr.rel (%p159_p10) target bundleno = 451 (0x1c3), region = 32  ;;  %s405_s11 = sshll.u32 (!%p159_p10), %s181_s10, 3 }
  0x10   : > { %s413_s18 = sshll.u32 (!%p159_p10), %s565_s15, 7  ;;  %s183_s19 = scalar_lea.vmem (!%p159_p10), [#allocation2], %s405_s11 }
  0x11   : > { %s329_s21 = sshll.u32 (!%p159_p10), %s183_s19, 4  ;;  %s673_s27 = scalar_lea.hbm (!%p159_p10), %s723_s3, %s413_s18  ;;  %s675_s21 = int_to_ptr.vmem [resolvable:$true] %s329_s21 }
  0x14   : > { %v492_v0 = vld [vmem:[%s721_s1] sm:$0xff]   ;;  %v575_v1 = vmov 0.0   ;;  %vm576_vm0 = vmmov 0   ;;  %s185_s28 = scalar_select %p184_p11, %s565_s15, 1  ;;  %vm202_vm1 = vcmask 130048   ;;  %v493_v4 = vld [vmem:[%s722_s2 + $0x8] sm:$0xff]  }
  0x15   : > { %421 = vmatprep.subr.bf16.mxu0 %v575_v1  ;;  %427 = vmatprep.subr.bf16.mxu1 %v575_v1  ;;  %v494_v5 = vld [vmem:[%s722_s2] sm:$0xff]   ;;  %vm268_vm2 = vcmask 261120   ;;  %s497_s15 = scalar_lea.vmem %s675_s21, 128 }
  0x16   : > { %422 = vmatpush3.bf16.msra.mxu0 %v492_v0  ;;  %423 = vmatprep.mubr.msk.bf16.mxu0 %vm576_vm0, %v575_v1  ;;  %s406_s29 = sshll.u32 %s185_s28, 3  ;;  %s315_s28 = scalar_lea.sflag [#allocation3], %s181_s10 }
  0x17   : > { %431 = vmatprep.mubr.msk.bf16.mxu1 %vm576_vm0, %v575_v1  ;;  %s190_s5 = scalar_lea.vmem %s720_s0, %s406_s29  ;;  %428 = vmatpush3.bf16.msra.mxu1 %v493_v4  ;;  %p498_p12 = scmp.ne.s32.totalorder %s675_s21, %s497_s15 }
  0x18   : > { %v192_v2 = vld [vmem:[%s190_s5] sm:$0xff]  ;;  %429 = vmatprep.subr.bf16.mxu1 %v575_v1  ;;  %s577_s29 = smov [#allocation2]  }
  0x19   : > { %v193_v3 = vpack.c.bf16 %v192_v2, %v192_v2  ;;  %p499_p13 = pnand %p498_p12, %p638_p4  ;;  %s501_s30 = sshll.u32 %s577_s29, 4  ;;  %s502_s30 = int_to_ptr.vmem [resolvable:$false] %s501_s30 }
  0x1a   : > { %s503_s4 = scalar_lea.vmem %s502_s30, 256  ;;  %p504_p1 = scmp.lt.s32.totalorder %s675_s21, %s502_s30 }
  0x1b   : > { %424 = vmatmul.mubr.msk.bf16.vlgmr.msra.gmra.mxu0 %vm202_vm1, %v193_v3  ;;  %430 = vmatpush3.bf16.msra.mxu1 %v494_v5  ;;  %p500_p0 = pneg %p499_p13  ;;  %p505_p2 = scmp.lt.s32.totalorder %s503_s4, %s497_s15 }
  0x1d   : > { %p506_p3 = por %p505_p2, %p504_p1 }
  0x1f   : > { %p507_p5 = pnand %p506_p3, %p500_p0 }
  0xdb   : > { %v240_v6 = vpop.f32.mrf.mxu0 }
  0xdc   : > { %v247_v7 = vmul.f32 0.70710677, %v240_v6  ;;  %v246_v12 = vmul.f32 0.5, %v240_v6 }
  0xdd   : > { %v425_v8 = vpop.f32.mrf.mxu0 }
  0xde   : > { %495 = verf.f32 %v247_v7 }
  0xdf   : > { %v243_v9 = vpop.f32.mrf.mxu0 }
  0xe1   : > { %v426_v10 = vpop.f32.mrf.mxu0 }
  0xeb   : > { %v496_v11 = vpop.eup %495 }
  0xec   : > { %v249_v13 = vadd.f32 1.0, %v496_v11 }
  0xee   : > { %v250_v14 = vmul.f32 %v249_v13, %v246_v12 }
  0xf0   : > { %v251_v15 = vpack.c.bf16 %v250_v14, %v250_v14 }
  0xf2   : > { %432 = vmatmul.mubr.msk.bf16.vlgmr.msra.gmra.mxu1 %vm268_vm2, %v251_v15 }
 0x1b2   : > { %v306_v16 = vpop.f32.mrf.mxu1 }
 0x1b3   : > { %v312_v17 = vadd.f32 %v306_v16, %v192_v2 }
 0x1b4   : > { %v433_v18 = vpop.f32.mrf.mxu1 }
 0x1b5   : > { %313 = vst.msk [vmem:[%s183_s19] sm:$0xff] %vm202_vm1, %v312_v17 }
 0x1b6   : > { %v309_v19 = vpop.f32.mrf.mxu1 }
 0x1b7   : > { %510 = shalt.err (!%p507_p5)
}
 0x1b8   : > { %s511_s5 = scalar_lea.hbm %s673_s27, 128  ;;  %s515_s8 = scalar_lea.hbm %s723_s3, 256 }
 0x1b9   : > { %p512_p6 = scmp.ne.s32.totalorder %s673_s27, %s511_s5  ;;  %p516_p10 = scmp.lt.s32.totalorder %s673_s27, %s723_s3 }
 0x1ba   : > { %p517_p11 = scmp.lt.s32.totalorder %s515_s8, %s511_s5 }
 0x1bb   : > { %p513_p7 = pnand %p512_p6, %p638_p4 }
 0x1bc   : > { %p518_p12 = por %p517_p11, %p516_p10 }
 0x1bd   : > { %p514_p9 = pneg %p513_p7 }
 0x1bf   : > { %p519_p13 = pnand %p518_p12, %p514_p9 }
 0x1c1   : > { %522 = shalt.err (!%p519_p13)
}
 0x1c2   : > { %435 = dma.vmem_to_hbm [thread:$0]  (%p638_p4), %s675_s21, 128, %s673_s27, %s315_s28   ;;  %v434_v20 = vpop.f32.mrf.mxu1 }
 0x1c3 PF: > { %p441_p0 = scmp.ge.s32.totalorder %s573_s17, 2  ;;  %s341_s11 = sand.u32 1, %s553_s12  }
 0x1c4   : > { %s342_s18 = scalar_lea.sflag [#allocation3], %s341_s11 }
 0x1c5   : > { %p438_p1 = pnand %p441_p0, %p645_p8 }
 0x1c7   : > { %p439_p2 = pneg %p438_p1 }
 0x1c9   : > { %548 = dma.done.wait (%p439_p2), %s342_s18, 128  }
 0x1ca   : > { %550 = vsyncadd (%p439_p2), %s342_s18, 4294967168  ;;  %s16_s17 = sadd.s32 1, %s573_s17   ;;  %s726_s12 = smov %s557_s13 }
 0x1cb   : > { %p13_p3 = scmp.ge.s32.totalorder %s16_s17, 4   ;;  %s727_s13 = smov %s561_s14 }
 0x1cc   : > { %s728_s14 = smov %s651_s25  ;;  %s729_s15 = smov %s569_s16 }
 0x1cd   : > { %s730_s16 = smov %s732_s20  ;;  %15 = sbr.rel (!%p13_p3) target bundleno = 4 (0x4), region = 67 }
 0x1d2   :  { %347 = vsyncpa [#allocation3], 1 }
 0x1d3   :  { %349 = vsyncpa [#allocation3 + $0x1], 1 }

</bundles_post_ra>
